<compile_context>
chip_gen: v5e
topology: v5e:2x2
jax: 0.10.0
libtpu: 0.0.40
codegen_flags: <defaults>
</compile_context>

<pallas_src>
import functools

import jax
import jax.numpy as jnp
from jax.experimental import pallas as pl
from jax.experimental.pallas import tpu as pltpu

LANE = 128
SUBLANE = 8


def _round_up(x, m):
    return ((x + m - 1) // m) * m


def _div_tile(total, cap, mult):
    """Largest multiple of `mult` that divides `total` and is <= cap.

    `total` is assumed to be a positive multiple of `mult`."""
    t = min(cap, total)
    t -= t % mult
    t = max(t, mult)
    while total % t:
        t -= mult
    return t


def _vmem_budget():
    """(tiling budget, vmem_limit_bytes) derived from the part's VMEM size."""
    cap = None
    try:
        info = pltpu.get_tpu_info()
        cap = getattr(info, "vmem_capacity_bytes", None)
    except Exception:  # pragma: no cover - trace-time HW query best effort
        cap = None
    if not cap:
        cap = 64 * 1024 * 1024  # conservative default: v7x per-TensorCore VMEM
    cap = int(cap)
    budget = min(cap // 2, 80 * 1024 * 1024)          # tile-sizing budget
    limit = min((cap * 3) // 4, 96 * 1024 * 1024)     # scoped VMEM limit
    limit = max(limit, 32 * 1024 * 1024)
    return budget, limit


# ---------------------------------------------------------------------------
# Kernel 1: row-tiled L2 normalization (F.normalize(p=2, dim=1, eps=1e-12)).
# f32 math, bf16 output (native MXU dtype for kernel 2, half the HBM bytes).
# ---------------------------------------------------------------------------
def _l2_normalize_kernel(x_ref, o_ref, *, eps):
    x = x_ref[...]
    norm = jnp.sqrt(jnp.sum(x * x, axis=-1, keepdims=True))
    o_ref[...] = (x / jnp.maximum(norm, eps)).astype(o_ref.dtype)


# ---------------------------------------------------------------------------
# Kernel 2: tiled Gram matrix + two fused masked per-row reductions.
#   fr_ref : (RT, DP)  bf16 normalized rows of this row tile
#   fc_ref : (CT, DP)  bf16 normalized rows of this column tile (CT == BP when
#                      the whole matrix is VMEM-resident)
#   lr_ref : (RT, 1)   row labels   (int32)
#   lc_ref : (1, CT)   column labels (int32)
#   o_ref  : (RT, 128) lane 0 = sum_{same-label j} dot, lane 1 = sum_j dot
#   acc_*  : (RT, 1)   f32 VMEM accumulators over the column-tile (j) axis
# ---------------------------------------------------------------------------
def _opl_partial_kernel(fr_ref, fc_ref, lr_ref, lc_ref, o_ref,
                        acc_same_ref, acc_tot_ref):
    j = pl.program_id(1)

    @pl.when(j == 0)
    def _():
        acc_same_ref[...] = jnp.zeros_like(acc_same_ref)
        acc_tot_ref[...] = jnp.zeros_like(acc_tot_ref)

    # (RT, DP) . (CT, DP)^T : bf16 operands on the MXU, f32 accumulation.
    dot = jax.lax.dot_general(
        fr_ref[...], fc_ref[...],
        dimension_numbers=(((1,), (1,)), ((), ())),
        preferred_element_type=jnp.float32)                      # (RT, CT)

    same = lr_ref[...] == lc_ref[...]                             # (RT, CT)

    # Diagonal (i == j) terms land in `same`; they are removed in the epilogue
    # by subtracting the exact trace sum_i ||f_i||^2.  Padded rows are zero
    # vectors -> contribute 0 -> no validity mask needed.
    acc_same_ref[...] += jnp.sum(jnp.where(same, dot, 0.0),
                                 axis=-1, keepdims=True)
    acc_tot_ref[...] += jnp.sum(dot, axis=-1, keepdims=True)

    @pl.when(j == pl.num_programs(1) - 1)
    def _():
        rt, lanes = o_ref.shape
        lane = jax.lax.broadcasted_iota(jnp.int32, (rt, lanes), 1)
        o_ref[...] = jnp.where(lane == 0, acc_same_ref[...],
                               jnp.where(lane == 1, acc_tot_ref[...], 0.0))


def _choose_gram_tiles(BP, DP, budget):
    """Pick (row_tile, col_tile) for kernel 2 under a VMEM budget (bf16 feats)."""
    def cost(rt, ct):
        feats = 2 * (rt + ct) * DP * 2          # double-buffered bf16 blocks
        out = 2 * rt * LANE * 4                 # output block
        labels = 2 * (rt * LANE + SUBLANE * ct) * 4   # padded label blocks
        acc = 2 * rt * LANE * 4                 # accumulators (lane padded)
        return feats + out + labels + acc

    # Preferred: full column residency (column block DMA'd once for the grid).
    rt = _div_tile(BP, 512, LANE)
    ct = BP
    while cost(rt, ct) > budget and rt > LANE:
        rt = _div_tile(BP, rt - LANE, LANE)
    if cost(rt, ct) > budget:
        # Fallback: tiled columns.  Keep RT large (column stream is re-fetched
        # BP/RT times), shrink CT first.
        rt = _div_tile(BP, 512, LANE)
        ct = _div_tile(BP, 256, LANE)
        while cost(rt, ct) > budget and ct > LANE:
            ct = _div_tile(BP, ct - LANE, LANE)
        while cost(rt, ct) > budget and rt > LANE:
            rt = _div_tile(BP, rt - LANE, LANE)
        # NOTE: for extremely large D even 128x128 may exceed the budget; the
        # vmem_limit (>= 32 MiB) still covers realistic D.

    # Megacore: make sure the "parallel" row axis has >= 2 tiles when possible.
    if BP >= 2 * LANE and BP // rt < 2:
        rt = _div_tile(BP, BP // 2, LANE)
    return rt, ct


def orthogonal_projection_loss(features, labels, gamma=0.5):
    """OrthogonalProjectionLoss.forward.  features: (B, D), labels: (B,)."""
    B, D = features.shape
    budget, vmem_limit = _vmem_budget()

    # Lane-dense padding (zero feature rows).  Padded rows contribute exactly 0
    # to every dot-product sum, so no in-kernel validity masking is required.
    BP = _round_up(B, LANE)
    DP = _round_up(D, LANE)

    feats = jnp.zeros((BP, DP), jnp.float32).at[:B, :D].set(
        features.astype(jnp.float32))
    labs = jnp.full((BP,), -1, jnp.int32).at[:B].set(labels.astype(jnp.int32))

    # ---- kernel 1: L2 normalize (independent row tiles -> "parallel") ------
    # VMEM per row: 2 bufs x (4B f32 in + 2B bf16 out) = 12 * DP bytes.
    rtn_cap = max(SUBLANE, budget // (12 * DP))
    RTN = _div_tile(BP, min(rtn_cap, 1024), SUBLANE)
    feats_n = pl.pallas_call(
        functools.partial(_l2_normalize_kernel, eps=1e-12),
        out_shape=jax.ShapeDtypeStruct((BP, DP), jnp.bfloat16),
        grid=(BP // RTN,),
        in_specs=[pl.BlockSpec((RTN, DP), lambda i: (i, 0))],
        out_specs=pl.BlockSpec((RTN, DP), lambda i: (i, 0)),
        compiler_params=pltpu.CompilerParams(
            dimension_semantics=("parallel",),
            vmem_limit_bytes=vmem_limit),
    )(feats)

    # ---- kernel 2: tiled Gram + fused per-row partial sums ------------------
    RT, CT = _choose_gram_tiles(BP, DP, budget)

    lab_col = labs.reshape(BP, 1)
    lab_row = labs.reshape(1, BP)

    partials = pl.pallas_call(
        _opl_partial_kernel,
        out_shape=jax.ShapeDtypeStruct((BP, LANE), jnp.float32),
        grid=(BP // RT, BP // CT),
        in_specs=[
            pl.BlockSpec((RT, DP), lambda i, j: (i, 0)),   # row features (resident over j)
            pl.BlockSpec((CT, DP), lambda i, j: (j, 0)),   # column features (CT==BP -> fetched once)
            pl.BlockSpec((RT, 1), lambda i, j: (i, 0)),    # row labels
            pl.BlockSpec((1, CT), lambda i, j: (0, j)),    # column labels
        ],
        out_specs=pl.BlockSpec((RT, LANE), lambda i, j: (i, 0)),
        scratch_shapes=[pltpu.VMEM((RT, 1), jnp.float32),
                        pltpu.VMEM((RT, 1), jnp.float32)],
        compiler_params=pltpu.CompilerParams(
            dimension_semantics=("parallel", "arbitrary"),
            vmem_limit_bytes=vmem_limit),
    )(feats_n, feats_n, lab_col, lab_row)

    # ---- scalar epilogue in XLA ---------------------------------------------
    same_sum = jnp.sum(partials[:, 0])     # sum over same-label pairs, incl. diag
    tot_sum = jnp.sum(partials[:, 1])      # sum over all pairs

    # Exact diagonal of the bf16 Gram matrix (padded rows contribute 0).
    trace = jnp.sum(jnp.square(feats_n.astype(jnp.float32)))
    pos_dot = same_sum - trace
    neg_dot = tot_sum - same_sum

    # Pair counts from the (unpadded) labels; no in-kernel count reductions.
    lab = labels.astype(jnp.int32)
    n_same = jnp.sum((lab[:, None] == lab[None, :]).astype(jnp.float32))
    pos_cnt = n_same - jnp.float32(B)
    neg_cnt = jnp.float32(B * B) - n_same

    return (1.0 - pos_dot / (pos_cnt + 1e-6)
            + gamma * neg_dot / (neg_cnt + 1e-6))


# ---------------------------------------------------------------------------
# Pure-JAX reference mirroring the PyTorch module, for a correctness check.
# ---------------------------------------------------------------------------
def _ref_opl(features, labels, gamma=0.5):
    norm = jnp.sqrt(jnp.sum(features.astype(jnp.float32) ** 2, axis=1,
                            keepdims=True))
    f = features / jnp.maximum(norm, 1e-12)
    lab = labels[:, None]
    mask = lab == lab.T
    eye = jnp.eye(mask.shape[0], dtype=bool)
    mask_pos = jnp.where(eye, False, mask).astype(jnp.float32)
    mask_neg = jnp.logical_not(mask).astype(jnp.float32)
    dot = f @ f.T
    pos_mean = jnp.sum(mask_pos * dot) / (jnp.sum(mask_pos) + 1e-6)
    neg_mean = jnp.sum(mask_neg * dot) / (jnp.sum(mask_neg) + 1e-6)
    return 1.0 - pos_mean + gamma * neg_mean


if __name__ == "__main__":
    key = jax.random.PRNGKey(0)
    k_f, k_l = jax.random.split(key)

    B, D, n_classes = 16, 32, 4
    features = jax.random.normal(k_f, (B, D), jnp.float32)
    labels = jax.random.randint(k_l, (B,), 0, n_classes, dtype=jnp.int32)

    loss = jax.block_until_ready(
        orthogonal_projection_loss(features, labels, gamma=0.5))
    ref = jax.block_until_ready(_ref_opl(features, labels, gamma=0.5))

    assert loss.shape == (), loss.shape
    assert bool(jnp.isfinite(loss)), float(loss)
    # bf16 Gram operands (f32 accumulation) -> loosened tolerance vs f32 ref.
    assert jnp.allclose(loss, ref, atol=2e-2, rtol=2e-2), (float(loss), float(ref))
    print("KERNEL_OK")
</pallas_src>

<mosaic_0001>
module attributes {stable_mosaic.version = 11 : i64} {
  func.func @_l2_normalize_kernel(%arg0: i32, %arg1: memref<128x128xf32, #tpu.memory_space<vmem>>, %arg2: memref<128x128xbf16, #tpu.memory_space<vmem>>) attributes {dimension_semantics = [#tpu.dimension_semantics<parallel>], iteration_bounds = array<i64: 1>, scalar_prefetch = 0 : i64, scratch_operands = 0 : i64, tpu.core_type = #tpu.core_type<tc>, window_params = [{transform_indices = @transform_0, window_bounds = array<i64: 128, 128>}, {transform_indices = @transform_1, window_bounds = array<i64: 128, 128>}]} {
    %c0 = arith.constant 0 : index
    %c0_0 = arith.constant 0 : index
    %0 = vector.load %arg1[%c0, %c0_0] : memref<128x128xf32, #tpu.memory_space<vmem>>, vector<128x128xf32>
    %1 = arith.mulf %0, %0 : vector<128x128xf32>
    %cst = arith.constant dense<0.000000e+00> : vector<128xf32>
    %2 = vector.multi_reduction <add>, %1, %cst [1] : vector<128x128xf32> to vector<128xf32>
    %3 = vector.shape_cast %2 : vector<128xf32> to vector<128x1xf32>
    %4 = math.sqrt %3 : vector<128x1xf32>
    %cst_1 = arith.constant 9.99999996E-13 : f32
    %5 = vector.broadcast %cst_1 : f32 to vector<128x1xf32>
    %6 = arith.maximumf %4, %5 : vector<128x1xf32>
    %7 = vector.broadcast %6 : vector<128x1xf32> to vector<128x128xf32>
    %8 = arith.divf %0, %7 : vector<128x128xf32>
    %9 = arith.truncf %8 : vector<128x128xf32> to vector<128x128xbf16>
    %c0_2 = arith.constant 0 : index
    %c0_3 = arith.constant 0 : index
    %10 = vector.load %arg2[%c0_2, %c0_3] : memref<128x128xbf16, #tpu.memory_space<vmem>>, vector<128x128xbf16>
    tpu.vector_store %arg2[%c0_2, %c0_3], %9 {strides = array<i32>} : memref<128x128xbf16, #tpu.memory_space<vmem>>, vector<128x128xbf16>,
    return
  }
  func.func @transform_0(%arg0: i32) -> (i32, i32) {
    %c0_i32 = arith.constant 0 : i32
    %c0_i32_0 = arith.constant 0 : i32
    return %arg0, %c0_i32 : i32, i32
  }
  func.func @transform_1(%arg0: i32) -> (i32, i32) {
    %c0_i32 = arith.constant 0 : i32
    %c0_i32_0 = arith.constant 0 : i32
    return %arg0, %c0_i32 : i32, i32
  }
}

</mosaic_0001>

<bundles_post_ra>
// kernel: tpu_custom_call.1
= control target key start
LH: loop header
LB: loop body
LE: loop exit
PB: predicated region body
PF: predicated region fallthrough
CT: control target
= control target key end

     0   :  { %6 = vsyncpa [#allocation3], 0  ;;  %s1295_s0 = inlined_call_operand.hbm [shape: f32[128,128], index: 0, kind: input, shape index: {}]   ;;  %s1296_s1 = inlined_call_operand.hbm [shape: bf16[128,128], index: 1, kind: output, shape index: {}]  }
   0x1   :  { %7 = vsyncpa [#allocation4], 0  ;;  %s12_s8 = sshll.u32 %s1295_s0, 4  ;;  %s759_s9 = smov [#allocation2]   ;;  %s13_s8 = int_to_ptr.hbm [resolvable:$true] %s12_s8 }
   0x2   :  { %s14_s10 = sshll.u32 %s759_s9, 4  ;;  %s760_s11 = smov 128   ;;  %s15_s10 = int_to_ptr.vmem [resolvable:$true] %s14_s10 }
   0x3   :  { %s761_s12 = smov 8  }
   0x4   :  { %20 = dma.hbm_to_vmem [thread:$0]  %s13_s8, 2048, %s15_s10, [#allocation3], %s760_s11, %s760_s11, %s761_s12  }
   0x5   :  { %755 = dma.done.wait [#allocation3], 2048  }
   0x6   :  { %756 = vsyncadd [#allocation3], 4294965248  ;;  %v778_v0 = vld [vmem:[#allocation2 + $0x20] sm:$0xff]  ;;  %v780_v1 = vld [vmem:[#allocation2 + $0x10] sm:$0xff]  ;;  %s762_s0 = smov [#allocation5]   ;;  %s575_s16 = sshll.u32 %s1296_s1, 4  ;;  %s576_s16 = int_to_ptr.hbm [resolvable:$true] %s575_s16 }
   0x7   :  { %v782_v2 = vld [vmem:[#allocation2] sm:$0xff]  ;;  %v45_v3 = vmul.f32 %v778_v0, %v778_v0  ;;  %v43_v4 = vmul.f32 %v780_v1, %v780_v1  ;;  %v790_v6 = vld [vmem:[#allocation2 + $0x28] sm:$0xff]  ;;  %v792_v7 = vld [vmem:[#allocation2 + $0x18] sm:$0xff]  ;;  %s573_s13 = sshll.u32 %s762_s0, 4  ;;  %s763_s17 = smov 64   ;;  %s574_s13 = int_to_ptr.vmem [resolvable:$true] %s573_s13 }
   0x8   :  { %v41_v5 = vmul.f32 %v782_v2, %v782_v2  ;;  %v794_v8 = vld [vmem:[#allocation2 + $0x8] sm:$0xff]  ;;  %v46_v9 = vmul.f32 %v790_v6, %v790_v6  ;;  %v44_v10 = vmul.f32 %v792_v7, %v792_v7  ;;  %v802_v12 = vld [vmem:[#allocation2 + $0x40] sm:$0xff]  ;;  %v804_v13 = vld [vmem:[#allocation2 + $0x38] sm:$0xff]  ;;  %s764_s18 = smov 4  }
   0x9   :  { %65 = vadd.xlane.f32.xlu2 %v45_v3  ;;  %61 = vadd.xlane.f32.xlu1 %v43_v4  ;;  %v42_v11 = vmul.f32 %v794_v8, %v794_v8  ;;  %v806_v14 = vld [vmem:[#allocation2 + $0x30] sm:$0xff]  ;;  %v49_v15 = vmul.f32 %v802_v12, %v802_v12  ;;  %v48_v16 = vmul.f32 %v804_v13, %v804_v13  ;;  %v814_v18 = vld [vmem:[#allocation2 + $0x58] sm:$0xff]  ;;  %v818_v20 = vld [vmem:[#allocation2 + $0x48] sm:$0xff] }
   0xa   :  { %57 = vadd.xlane.f32.xlu0 %v41_v5  ;;  %v47_v17 = vmul.f32 %v806_v14, %v806_v14  ;;  %v816_v19 = vld [vmem:[#allocation2 + $0x50] sm:$0xff]  ;;  %v52_v21 = vmul.f32 %v814_v18, %v814_v18  ;;  %v50_v23 = vmul.f32 %v818_v20, %v818_v20  ;;  %v826_v25 = vld [vmem:[#allocation2 + $0x68] sm:$0xff]  ;;  %v828_v26 = vld [vmem:[#allocation2 + $0x60] sm:$0xff] }
   0xb   :  { %v51_v22 = vmul.f32 %v816_v19, %v816_v19  ;;  %v39_v24 = vld [vmem:[#allocation2 + $0x70] sm:$0xff]  ;;  %v54_v28 = vmul.f32 %v826_v25, %v826_v25  ;;  %v53_v29 = vmul.f32 %v828_v26, %v828_v26  ;;  %v40_v30 = vld [vmem:[#allocation2 + $0x78] sm:$0xff] }
   0xc   :  { %v55_v27 = vmul.f32 %v39_v24, %v39_v24  ;;  %v56_v31 = vmul.f32 %v40_v30, %v40_v30 }
  0x11   :  { %67 = vadd.xlane.f32.xlu2 %v46_v9  ;;  %63 = vadd.xlane.f32.xlu1 %v44_v10 }
  0x12   :  { %59 = vadd.xlane.f32.xlu0 %v42_v11 }
  0x19   :  { %73 = vadd.xlane.f32.xlu2 %v49_v15  ;;  %71 = vadd.xlane.f32.xlu1 %v48_v16 }
  0x1a   :  { %69 = vadd.xlane.f32.xlu0 %v47_v17 }
  0x21   :  { %79 = vadd.xlane.f32.xlu2 %v52_v21  ;;  %77 = vadd.xlane.f32.xlu1 %v51_v22 }
  0x22   :  { %75 = vadd.xlane.f32.xlu0 %v50_v23 }
  0x29   :  { %85 = vadd.xlane.f32.xlu2 %v55_v27  ;;  %83 = vadd.xlane.f32.xlu1 %v54_v28 }
  0x2a   :  { %81 = vadd.xlane.f32.xlu0 %v53_v29 }
  0x32   :  { %87 = vadd.xlane.f32.xlu0 %v56_v31 }
  0x7c   :  { %v66_v32 = vpop.xlane.xlu2 %65  ;;  %v62_v33 = vpop.xlane.xlu1 %61 }
  0x7d   :  { %641 = vrsqrt.f32 %v66_v32  ;;  %v834_v34 = vpop.xlane.xlu0 %57  ;;  %vm144_vm0 = vcmp.eq.f32.partialorder %v66_v32, inf  ;;  %vm146_vm1 = vcmp.eq.f32.partialorder %v66_v32, 0.0  ;;  %v147_v52 = vand.u32 2147483648, %v66_v32 }
  0x7e   :  { %643 = vrsqrt.f32 %v62_v33  ;;  %vm120_vm2 = vcmp.eq.f32.partialorder %v62_v33, inf  ;;  %vm122_vm3 = vcmp.eq.f32.partialorder %v62_v33, 0.0  ;;  %v123_v56 = vand.u32 2147483648, %v62_v33 }
  0x7f   :  { %645 = vrsqrt.f32 %v834_v34  ;;  %vm96_vm4 = vcmp.eq.f32.partialorder %v834_v34, inf  ;;  %vm98_vm5 = vcmp.eq.f32.partialorder %v834_v34, 0.0  ;;  %v99_v5 = vand.u32 2147483648, %v834_v34 }
  0x83   :  { %v642_v35 = vpop.eup %641 }
  0x84   :  { %v644_v36 = vpop.eup %643  ;;  %v138_v37 = vmul.f32 %v642_v35, %v66_v32  ;;  %v837_v38 = vpop.xlane.xlu2 %67 }
  0x85   :  { %v839_v39 = vpop.xlane.xlu1 %63  ;;  %v646_v40 = vpop.eup %645  ;;  %v114_v41 = vmul.f32 %v644_v36, %v62_v33  ;;  %647 = vrsqrt.f32 %v837_v38  ;;  %vm156_vm6 = vcmp.eq.f32.partialorder %v837_v38, inf  ;;  %vm158_vm7 = vcmp.eq.f32.partialorder %v837_v38, 0.0 }
  0x86   :  { %v842_v42 = vpop.xlane.xlu0 %59  ;;  %v139_v43 = vmul.f32 %v642_v35, %v138_v37  ;;  %v90_v44 = vmul.f32 %v646_v40, %v834_v34  ;;  %649 = vrsqrt.f32 %v839_v39  ;;  %vm132_vm8 = vcmp.eq.f32.partialorder %v839_v39, inf }
  0x87   :  { %v115_v45 = vmul.f32 %v644_v36, %v114_v41  ;;  %651 = vrsqrt.f32 %v842_v42  ;;  %vm134_vm9 = vcmp.eq.f32.partialorder %v839_v39, 0.0  ;;  %vm108_vm10 = vcmp.eq.f32.partialorder %v842_v42, inf }
  0x88   :  { %v140_v46 = vmul.f32 0.5, %v139_v43  ;;  %v91_v47 = vmul.f32 %v646_v40, %v90_v44  ;;  %vm110_vm11 = vcmp.eq.f32.partialorder %v842_v42, 0.0 }
  0x89   :  { %v116_v48 = vmul.f32 0.5, %v115_v45 }
  0x8a   :  { %v141_v49 = vsub.f32 1.5, %v140_v46  ;;  %v92_v50 = vmul.f32 0.5, %v91_v47 }
  0x8b   :  { %v648_v51 = vpop.eup %647  ;;  %v117_v53 = vsub.f32 1.5, %v116_v48  ;;  %v135_v48 = vand.u32 2147483648, %v839_v39 }
  0x8c   :  { %v650_v54 = vpop.eup %649  ;;  %v142_v55 = vmul.f32 %v642_v35, %v141_v49  ;;  %v93_v57 = vsub.f32 1.5, %v92_v50  ;;  %v150_v58 = vmul.f32 %v648_v51, %v837_v38  ;;  %v848_v59 = vpop.xlane.xlu2 %73 }
  0x8d   :  { %v118_v60 = vmul.f32 %v644_v36, %v117_v53  ;;  %v126_v61 = vmul.f32 %v650_v54, %v839_v39  ;;  %v853_v62 = vpop.xlane.xlu1 %71  ;;  %v652_v63 = vpop.eup %651  ;;  %653 = vrsqrt.f32 %v848_v59  ;;  %v195_v53 = vand.u32 2147483648, %v848_v59 }
  0x8e   :  { %v143_v3 = vmul.f32 %v142_v55, %v66_v32  ;;  %v94_v4 = vmul.f32 %v646_v40, %v93_v57  ;;  %v151_v9 = vmul.f32 %v648_v51, %v150_v58  ;;  %v102_v15 = vmul.f32 %v652_v63, %v842_v42 }
  0x8f   :  { %v119_v10 = vmul.f32 %v118_v60, %v62_v33  ;;  %v127_v11 = vmul.f32 %v650_v54, %v126_v61  ;;  %655 = vrsqrt.f32 %v853_v62 }
  0x90   :  { %v145_v16 = vsel %vm144_vm0, %v66_v32, %v143_v3  ;;  %v95_v17 = vmul.f32 %v94_v4, %v834_v34  ;;  %v152_v21 = vmul.f32 0.5, %v151_v9  ;;  %v103_v27 = vmul.f32 %v652_v63, %v102_v15 }
  0x91   :  { %v148_v22 = vsel %vm146_vm1, %v147_v52, %v145_v16  ;;  %v121_v23 = vsel %vm120_vm2, %v62_v33, %v119_v10  ;;  %v128_v24 = vmul.f32 0.5, %v127_v11  ;;  %v111_v52 = vand.u32 2147483648, %v842_v42 }
  0x92   :  { %v863_v28 = vmax.f32 %v148_v22, 1e-12  ;;  %v124_v29 = vsel %vm122_vm3, %v123_v56, %v121_v23  ;;  %v97_v30 = vsel %vm96_vm4, %v834_v34, %v95_v17  ;;  %v153_v31 = vsub.f32 1.5, %v152_v21 }
  0x93   :  { %v869_v35 = vmax.f32 %v124_v29, 1e-12  ;;  %v100_v36 = vsel %vm98_vm5, %v99_v5, %v97_v30  ;;  %v129_v32 = vsub.f32 1.5, %v128_v24  ;;  %v104_v37 = vmul.f32 0.5, %v103_v27  ;;  %v874_v40 = vpop.eup %653 }
  0x94   :  { %657 = vrcp.f32 %v863_v28  ;;  %v879_v41 = vmax.f32 %v100_v36, 1e-12  ;;  %v154_v43 = vmul.f32 %v648_v51, %v153_v31  ;;  %v159_v34 = vand.u32 2147483648, %v837_v38 }
  0x95   :  { %659 = vrcp.f32 %v869_v35  ;;  %v877_v33 = vpop.eup %655  ;;  %v130_v44 = vmul.f32 %v650_v54, %v129_v32  ;;  %v105_v45 = vsub.f32 1.5, %v104_v37  ;;  %v366_v50 = vand.u32 2147483647, %v863_v28 }
  0x96   :  { %661 = vrcp.f32 %v879_v41  ;;  %v155_v46 = vmul.f32 %v154_v43, %v837_v38  ;;  %v368_v51 = vand.u32 2147483648, %v863_v28  ;;  %v336_v61 = vand.u32 2147483647, %v869_v35 }
  0x97   :  { %v131_v47 = vmul.f32 %v130_v44, %v839_v39  ;;  %v106_v58 = vmul.f32 %v652_v63, %v105_v45  ;;  %vm362_vm12 = vweird.f32 %v863_v28  ;;  %v338_v15 = vand.u32 2147483648, %v869_v35  ;;  %v1033_v45 = vpop.xlane.xlu1 %77 }
  0x98   :  { %v157_v56 = vsel %vm156_vm6, %v837_v38, %v155_v46  ;;  %v186_v16 = vmul.f32 %v874_v40, %v848_v59  ;;  %v174_v38 = vmul.f32 %v877_v33, %v853_v62  ;;  %vm930_vm13 = vcmp.eq.f32.partialorder %v366_v50, 8.507059e+37 }
  0x99   :  { %v133_v57 = vsel %vm132_vm8, %v839_v39, %v131_v47  ;;  %v160_v3 = vsel %vm158_vm7, %v159_v34, %v157_v56  ;;  %v107_v21 = vmul.f32 %v106_v58, %v842_v42  ;;  %v369_v23 = vor.u32 1.1754944e-38, %v368_v51 }
  0x9a   :  { %v890_v49 = vpop.eup %657  ;;  %v136_v4 = vsel %vm134_vm9, %v135_v48, %v133_v57  ;;  %v914_v9 = vmax.f32 %v160_v3, 1e-12  ;;  %vm332_vm14 = vweird.f32 %v869_v35  ;;  %vm941_vm1 = vcmp.eq.f32.partialorder %v336_v61, 8.507059e+37 }
  0x9b   :  { %v897_v54 = vpop.eup %659  ;;  %v358_v55 = vmul.f32 %v890_v49, %v863_v28  ;;  %v916_v10 = vmax.f32 %v136_v4, 1e-12  ;;  %vm363_vm15 = vweird.f32 %v890_v49  ;;  %v339_v36 = vor.u32 1.1754944e-38, %v338_v15 }
  0x9c   :  { %v328_v60 = vmul.f32 %v897_v54, %v869_v35  ;;  %v918_v63 = vpop.eup %661  ;;  %663 = vrcp.f32 %v914_v9  ;;  %vm333_vm0 = vweird.f32 %v897_v54  ;;  %vm302_vm2 = vweird.f32 %v879_v41  ;;  %vm954_vm3 = vmor %vm362_vm12, %vm363_vm15 }
  0x9d   :  { %v359_v5 = vsub.f32 1.0, %v358_v55  ;;  %v298_v17 = vmul.f32 %v918_v63, %v879_v41  ;;  %665 = vrcp.f32 %v916_v10  ;;  %v381_v32 = vand.u32 2147483647, %v914_v9  ;;  %vm970_vm4 = vmor %vm332_vm14, %vm333_vm0 }
  0x9e   :  { %v329_v11 = vsub.f32 1.0, %v328_v60  ;;  %v109_v37 = vsel %vm108_vm10, %v842_v42, %v107_v21  ;;  %v187_v43 = vmul.f32 %v874_v40, %v186_v16  ;;  %v175_v44 = vmul.f32 %v877_v33, %v174_v38  ;;  %v1005_v21 = vpop.xlane.xlu2 %79 }
  0x9f   :  { %v360_v39 = vmul.f32 %v890_v49, %v359_v5  ;;  %v299_v29 = vsub.f32 1.0, %v298_v17  ;;  %v306_v34 = vand.u32 2147483647, %v879_v41  ;;  %v308_v46 = vand.u32 2147483648, %v879_v41  ;;  %v994_v5 = vpop.xlane.xlu0 %69 }
  0xa0   :  { %v330_v24 = vmul.f32 %v897_v54, %v329_v11  ;;  %v383_v47 = vand.u32 2147483648, %v914_v9  ;;  %v112_v48 = vsel %vm110_vm11, %v111_v52, %v109_v37  ;;  %vm303_vm5 = vweird.f32 %v918_v63 }
  0xa1   :  { %v361_v27 = vadd.f32 %v890_v49, %v360_v39  ;;  %v300_v55 = vmul.f32 %v918_v63, %v299_v29  ;;  %vm377_vm6 = vweird.f32 %v914_v9  ;;  %vm347_vm7 = vweird.f32 %v916_v10  ;;  %vm1017_vm15 = vmor %vm302_vm2, %vm303_vm5 }
  0xa2   :  { %v331_v30 = vadd.f32 %v897_v54, %v330_v24  ;;  %v664_v50 = vpop.eup %663  ;;  %v982_v52 = vmax.f32 %v112_v48, 1e-12  ;;  %vm984_vm8 = vcmp.eq.f32.partialorder %v381_v32, 8.507059e+37  ;;  %v351_v57 = vand.u32 2147483647, %v916_v10 }
  0xa3   :  { %v365_v51 = vsel %vm954_vm3, %v890_v49, %v361_v27  ;;  %v373_v49 = vmul.f32 %v664_v50, %v914_v9  ;;  %v666_v35 = vpop.eup %665  ;;  %v188_v58 = vmul.f32 0.5, %v187_v43  ;;  %v176_v60 = vmul.f32 0.5, %v175_v44 }
  0xa4   :  { %v335_v42 = vsel %vm970_vm4, %v897_v54, %v331_v30  ;;  %v370_v61 = vsel %vm930_vm13, %v369_v23, %v365_v51  ;;  %v384_v54 = vor.u32 1.1754944e-38, %v383_v47  ;;  %v343_v4 = vmul.f32 %v666_v35, %v916_v10 }
  0xa5   :  { %v374_v3 = vsub.f32 1.0, %v373_v49  ;;  %vm192_vm9 = vcmp.eq.f32.partialorder %v848_v59, inf  ;;  %vm180_vm10 = vcmp.eq.f32.partialorder %v853_v62, inf  ;;  %v340_v11 = vsel %vm941_vm1, %v339_v36, %v335_v42 }
  0xa6   :  { %v999_v15 = vadd.f32 %v918_v63, %v300_v55  ;;  %v353_v16 = vand.u32 2147483648, %v916_v10  ;;  %667 = vrcp.f32 %v982_v52  ;;  %vm194_vm11 = vcmp.eq.f32.partialorder %v848_v59, 0.0 }
  0xa7   :  { %v375_v38 = vmul.f32 %v664_v50, %v374_v3  ;;  %vm378_vm12 = vweird.f32 %v664_v50  ;;  %v344_v39 = vsub.f32 1.0, %v343_v4  ;;  %v189_v17 = vsub.f32 1.5, %v188_v58 }
  0xa8   :  { %vm182_vm13 = vcmp.eq.f32.partialorder %v853_v62, 0.0  ;;  %v371_v22 = vmul.f32 %v370_v61, %v778_v0  ;;  %vm1008_vm14 = vcmp.eq.f32.partialorder %v351_v57, 8.507059e+37  ;;  %v177_v24 = vsub.f32 1.5, %v176_v60  ;;  %vm379_vm1 = vmor %vm377_vm6, %vm378_vm12 }
  0xa9   :  { %669 = vrsqrt.f32 %v994_v5  ;;  %v376_v29 = vadd.f32 %v664_v50, %v375_v38  ;;  %v345_v30 = vmul.f32 %v666_v35, %v344_v39  ;;  %vm348_vm0 = vweird.f32 %v666_v35 }
  0xaa   :  { %v190_v0 = vmul.f32 %v874_v40, %v189_v17  ;;  %v341_v31 = vmul.f32 %v340_v11, %v780_v1  ;;  %v354_v36 = vor.u32 1.1754944e-38, %v353_v16  ;;  %v178_v32 = vmul.f32 %v877_v33, %v177_v24  ;;  %vm349_vm2 = vmor %vm347_vm7, %vm348_vm0 }
  0xab   :  { %671 = vrsqrt.f32 %v1005_v21  ;;  %v305_v37 = vsel %vm1017_vm15, %v918_v63, %v999_v15  ;;  %v380_v43 = vsel %vm379_vm1, %v664_v50, %v376_v29  ;;  %v346_v44 = vadd.f32 %v666_v35, %v345_v30 }
  0xac   :  { %v191_v40 = vmul.f32 %v190_v0, %v848_v59  ;;  %v668_v1 = vpop.eup %667  ;;  %v385_v9 = vsel %vm984_vm8, %v384_v54, %v380_v43  ;;  %v321_v33 = vand.u32 2147483647, %v982_v52  ;;  %v179_v47 = vmul.f32 %v178_v32, %v853_v62 }
  0xad   :  { %v183_v48 = vand.u32 2147483648, %v853_v62  ;;  %v386_v63 = vmul.f32 %v385_v9, %v790_v6  ;;  %v350_v50 = vsel %vm349_vm2, %v666_v35, %v346_v44  ;;  %v313_v51 = vmul.f32 %v668_v1, %v982_v52 }
  0xae   :  { %v323_v28 = vand.u32 2147483648, %v982_v52  ;;  %v355_v42 = vsel %vm1008_vm14, %v354_v36, %v350_v50  ;;  %v193_v10 = vsel %vm192_vm9, %v848_v59, %v191_v40  ;;  %v181_v49 = vsel %vm180_vm10, %v853_v62, %v179_v47  ;;  %v1094_v40 = vpop.xlane.xlu1 %83 }
  0xaf   :  { %v670_v55 = vpop.eup %669  ;;  %673 = vrsqrt.f32 %v1033_v45  ;;  %v601_v6 = vpack.c.bf16 %v386_v63, %v371_v22  ;;  %v356_v35 = vmul.f32 %v355_v42, %v792_v7  ;;  %v314_v56 = vsub.f32 1.0, %v313_v51  ;;  %v1076_v22 = vpop.xlane.xlu0 %75 }
  0xb0   :  { %v196_v57 = vsel %vm194_vm11, %v195_v53, %v193_v10  ;;  %vm318_vm3 = vweird.f32 %v668_v1  ;;  %v184_v61 = vsel %vm182_vm13, %v183_v48, %v181_v49  ;;  %v162_v3 = vmul.f32 %v670_v55, %v994_v5 }
  0xb1   :  { %v672_v58 = vpop.eup %671  ;;  %v1059_v60 = vmax.f32 %v196_v57, 1e-12  ;;  %629 = vst [vmem:[#allocation5 + $0x10] sm:$0xff] %v601_v6   ;;  %v596_v54 = vpack.c.bf16 %v356_v35, %v341_v31  ;;  %v315_v4 = vmul.f32 %v668_v1, %v314_v56  ;;  %v1064_v11 = vmax.f32 %v184_v61, 1e-12 }
  0xb2   :  { %v222_v7 = vmul.f32 %v672_v58, %v1005_v21  ;;  %v309_v59 = vor.u32 1.1754944e-38, %v308_v46  ;;  %vm307_vm4 = vcmp.eq.f32.partialorder %v306_v34, 8.507059e+37  ;;  %vm317_vm5 = vweird.f32 %v982_v52 }
  0xb3   :  { %675 = vrcp.f32 %v1059_v60  ;;  %628 = vst [vmem:[#allocation5 + $0x8] sm:$0xff] %v596_v54   ;;  %v316_v62 = vadd.f32 %v668_v1, %v315_v4  ;;  %vm319_vm6 = vmor %vm317_vm5, %vm318_vm3  ;;  %v324_v16 = vor.u32 1.1754944e-38, %v323_v28  ;;  %v163_v38 = vmul.f32 %v670_v55, %v162_v3 }
  0xb4   :  { %677 = vrcp.f32 %v1064_v11  ;;  %v310_v15 = vsel %vm307_vm4, %v309_v59, %v305_v37  ;;  %vm322_vm7 = vcmp.eq.f32.partialorder %v321_v33, 8.507059e+37  ;;  %v223_v46 = vmul.f32 %v672_v58, %v222_v7 }
  0xb5   :  { %v674_v53 = vpop.eup %673  ;;  %v320_v39 = vsel %vm319_vm6, %v668_v1, %v316_v62  ;;  %v164_v34 = vmul.f32 0.5, %v163_v38  ;;  %v311_v23 = vmul.f32 %v310_v15, %v782_v2  ;;  %679 = vrsqrt.f32 %v1076_v22 }
  0xb6   :  { %v210_v17 = vmul.f32 %v674_v53, %v1033_v45  ;;  %v325_v41 = vsel %vm322_vm7, %v324_v16, %v320_v39  ;;  %v224_v24 = vmul.f32 0.5, %v223_v46  ;;  %vm168_vm8 = vcmp.eq.f32.partialorder %v994_v5, inf }
  0xb7   :  { %v326_v52 = vmul.f32 %v325_v41, %v794_v8  ;;  %v165_v30 = vsub.f32 1.5, %v164_v34  ;;  %vm170_vm9 = vcmp.eq.f32.partialorder %v994_v5, 0.0  ;;  %v1089_v8 = vpop.xlane.xlu2 %85  ;;  %v171_v43 = vand.u32 2147483648, %v994_v5  ;;  %v1152_v46 = vpop.xlane.xlu0 %81 }
  0xb8   :  { %v211_v27 = vmul.f32 %v674_v53, %v210_v17  ;;  %v225_v36 = vsub.f32 1.5, %v224_v24  ;;  %vm228_vm10 = vcmp.eq.f32.partialorder %v1005_v21, inf  ;;  %vm230_vm11 = vcmp.eq.f32.partialorder %v1005_v21, 0.0 }
  0xb9   :  { %v1080_v29 = vpop.eup %675  ;;  %v591_v31 = vpack.c.bf16 %v326_v52, %v311_v23  ;;  %v166_v37 = vmul.f32 %v670_v55, %v165_v30  ;;  %v411_v48 = vand.u32 2147483647, %v1064_v11  ;;  %v231_v50 = vand.u32 2147483648, %v1005_v21 }
  0xba   :  { %v1083_v0 = vpop.eup %677  ;;  %v212_v2 = vmul.f32 0.5, %v211_v27  ;;  %v226_v44 = vmul.f32 %v672_v58, %v225_v36  ;;  %v418_v1 = vmul.f32 %v1080_v29, %v1059_v60  ;;  %681 = vrsqrt.f32 %v1089_v8 }
  0xbb   :  { %v403_v32 = vmul.f32 %v1083_v0, %v1064_v11  ;;  %592 = vst [vmem:[#allocation5] sm:$0xff] %v591_v31   ;;  %v167_v33 = vmul.f32 %v166_v37, %v994_v5  ;;  %v680_v51 = vpop.eup %679  ;;  %683 = vrsqrt.f32 %v1094_v40  ;;  %vm408_vm12 = vweird.f32 %v1083_v0 }
  0xbc   :  { %v213_v47 = vsub.f32 1.5, %v212_v2  ;;  %v227_v63 = vmul.f32 %v226_v44, %v1005_v21  ;;  %v198_v6 = vmul.f32 %v680_v51, %v1076_v22  ;;  %v419_v35 = vsub.f32 1.0, %v418_v1 }
  0xbd   :  { %v404_v9 = vsub.f32 1.0, %v403_v32  ;;  %v169_v55 = vsel %vm168_vm8, %v994_v5, %v167_v33  ;;  %v413_v61 = vand.u32 2147483648, %v1064_v11  ;;  %vm407_vm13 = vweird.f32 %v1064_v11 }
  0xbe   :  { %v214_v42 = vmul.f32 %v674_v53, %v213_v47  ;;  %v172_v10 = vsel %vm170_vm9, %v171_v43, %v169_v55  ;;  %v229_v49 = vsel %vm228_vm10, %v1005_v21, %v227_v63  ;;  %v199_v54 = vmul.f32 %v680_v51, %v198_v6  ;;  %vm1132_vm14 = vmor %vm407_vm13, %vm408_vm12 }
  0xbf   :  { %v405_v28 = vmul.f32 %v1083_v0, %v404_v9  ;;  %v1116_v57 = vmax.f32 %v172_v10, 1e-12  ;;  %v232_v58 = vsel %vm230_vm11, %v231_v50, %v229_v49  ;;  %v426_v7 = vand.u32 2147483647, %v1059_v60 }
  0xc0   :  { %v1121_v3 = vmax.f32 %v232_v58, 1e-12  ;;  %v215_v5 = vmul.f32 %v214_v42, %v1033_v45  ;;  %v1126_v4 = vpop.eup %681  ;;  %v428_v59 = vand.u32 2147483648, %v1059_v60  ;;  %vm1136_vm15 = vcmp.eq.f32.partialorder %v411_v48, 8.507059e+37 }
  0xc1   :  { %v406_v56 = vadd.f32 %v1083_v0, %v405_v28  ;;  %685 = vrcp.f32 %v1116_v57  ;;  %vm216_vm0 = vcmp.eq.f32.partialorder %v1033_v45, inf  ;;  %v1141_v11 = vpop.eup %683  ;;  %v420_v53 = vmul.f32 %v1080_v29, %v419_v35 }
  0xc2   :  { %687 = vrcp.f32 %v1121_v3  ;;  %v219_v16 = vand.u32 2147483648, %v1033_v45  ;;  %v414_v38 = vor.u32 1.1754944e-38, %v413_v61  ;;  %v217_v39 = vsel %vm216_vm0, %v1033_v45, %v215_v5 }
  0xc3   :  { %v410_v15 = vsel %vm1132_vm14, %v1083_v0, %v406_v56  ;;  %vm218_vm1 = vcmp.eq.f32.partialorder %v1033_v45, 0.0  ;;  %vm204_vm2 = vcmp.eq.f32.partialorder %v1076_v22, inf  ;;  %v200_v41 = vmul.f32 0.5, %v199_v54 }
  0xc4   :  { %v220_v17 = vsel %vm218_vm1, %v219_v16, %v217_v39  ;;  %vm206_vm3 = vcmp.eq.f32.partialorder %v1076_v22, 0.0  ;;  %v207_v34 = vand.u32 2147483648, %v1076_v22  ;;  %v258_v23 = vmul.f32 %v1126_v4, %v1089_v8 }
  0xc5   :  { %v415_v52 = vsel %vm1136_vm15, %v414_v38, %v410_v15  ;;  %v1160_v24 = vmax.f32 %v220_v17, 1e-12  ;;  %v267_v45 = vand.u32 2147483648, %v1089_v8  ;;  %v246_v27 = vmul.f32 %v1141_v11, %v1094_v40 }
  0xc6   :  { %v1166_v0 = vadd.f32 %v1080_v29, %v420_v53  ;;  %v201_v31 = vsub.f32 1.5, %v200_v41  ;;  %v259_v36 = vmul.f32 %v1126_v4, %v258_v23  ;;  %689 = vrsqrt.f32 %v1152_v46 }
  0xc7   :  { %v686_v30 = vpop.eup %685  ;;  %vm392_vm4 = vweird.f32 %v1116_v57  ;;  %v396_v37 = vand.u32 2147483647, %v1116_v57  ;;  %691 = vrcp.f32 %v1160_v24  ;;  %v416_v43 = vmul.f32 %v415_v52, %v804_v13 }
  0xc8   :  { %v388_v32 = vmul.f32 %v686_v30, %v1116_v57  ;;  %v688_v2 = vpop.eup %687  ;;  %v398_v44 = vand.u32 2147483648, %v1116_v57  ;;  %v202_v1 = vmul.f32 %v680_v51, %v201_v31  ;;  %v260_v9 = vmul.f32 0.5, %v259_v36 }
  0xc9   :  { %v463_v47 = vmul.f32 %v688_v2, %v1121_v3  ;;  %vm467_vm5 = vweird.f32 %v1121_v3  ;;  %v247_v48 = vmul.f32 %v1141_v11, %v246_v27  ;;  %v471_v63 = vand.u32 2147483647, %v1121_v3 }
  0xca   :  { %v389_v33 = vsub.f32 1.0, %v388_v32  ;;  %v473_v50 = vand.u32 2147483648, %v1121_v3  ;;  %v203_v28 = vmul.f32 %v202_v1, %v1076_v22  ;;  %v261_v55 = vsub.f32 1.5, %v260_v9 }
  0xcb   :  { %vm423_vm6 = vweird.f32 %v1080_v29  ;;  %vm393_vm7 = vweird.f32 %v686_v30  ;;  %v464_v51 = vsub.f32 1.0, %v463_v47  ;;  %v248_v42 = vmul.f32 0.5, %v247_v48 }
  0xcc   :  { %v390_v13 = vmul.f32 %v686_v30, %v389_v33  ;;  %vm252_vm8 = vcmp.eq.f32.partialorder %v1094_v40, inf  ;;  %v1184_v10 = vpop.eup %689  ;;  %vm1186_vm9 = vcmp.eq.f32.partialorder %v396_v37, 8.507059e+37  ;;  %v399_v6 = vor.u32 1.1754944e-38, %v398_v44  ;;  %vm394_vm13 = vmor %vm392_vm4, %vm393_vm7 }
  0xcd   :  { %vm468_vm10 = vweird.f32 %v688_v2  ;;  %v205_v35 = vsel %vm204_vm2, %v1076_v22, %v203_v28  ;;  %v692_v56 = vpop.eup %691  ;;  %vm422_vm11 = vweird.f32 %v1059_v60  ;;  %v465_v61 = vmul.f32 %v688_v2, %v464_v51 }
  0xce   :  { %v391_v58 = vadd.f32 %v686_v30, %v390_v13  ;;  %v208_v5 = vsel %vm206_vm3, %v207_v34, %v205_v35  ;;  %vm264_vm12 = vcmp.eq.f32.partialorder %v1089_v8, inf  ;;  %v249_v54 = vsub.f32 1.5, %v248_v42  ;;  %vm469_vm15 = vmor %vm467_vm5, %vm468_vm10 }
  0xcf   :  { %vm1200_vm14 = vcmp.eq.f32.partialorder %v471_v63, 8.507059e+37  ;;  %v448_v62 = vmul.f32 %v692_v56, %v1160_v24  ;;  %v1205_v53 = vmax.f32 %v208_v5, 1e-12  ;;  %v262_v15 = vmul.f32 %v1126_v4, %v261_v55  ;;  %vm1238_vm5 = vmor %vm422_vm11, %vm423_vm6 }
  0xd0   :  { %v395_v16 = vsel %vm394_vm13, %v686_v30, %v391_v58  ;;  %v466_v22 = vadd.f32 %v688_v2, %v465_v61  ;;  %v474_v38 = vor.u32 1.1754944e-38, %v473_v50  ;;  %v250_v39 = vmul.f32 %v1141_v11, %v249_v54  ;;  %v1222_v30 = vpop.xlane.xlu0 %87 }
  0xd1   :  { %v400_v17 = vsel %vm1186_vm9, %v399_v6, %v395_v16  ;;  %v449_v57 = vsub.f32 1.0, %v448_v62  ;;  %693 = vrcp.f32 %v1205_v53  ;;  %v234_v41 = vmul.f32 %v1184_v10, %v1152_v46 }
  0xd2   :  { %v401_v4 = vmul.f32 %v400_v17, %v806_v14  ;;  %v470_v34 = vsel %vm469_vm15, %v688_v2, %v466_v22  ;;  %v456_v23 = vand.u32 2147483647, %v1160_v24  ;;  %v458_v11 = vand.u32 2147483648, %v1160_v24 }
  0xd3   :  { %v450_v52 = vmul.f32 %v692_v56, %v449_v57  ;;  %vm453_vm0 = vweird.f32 %v692_v56  ;;  %v263_v27 = vmul.f32 %v262_v15, %v1089_v8  ;;  %v251_v3 = vmul.f32 %v250_v39, %v1094_v40 }
  0xd4   :  { %v606_v31 = vpack.c.bf16 %v416_v43, %v401_v4  ;;  %v475_v36 = vsel %vm1200_vm14, %v474_v38, %v470_v34  ;;  %vm254_vm1 = vcmp.eq.f32.partialorder %v1094_v40, 0.0  ;;  %v255_v14 = vand.u32 2147483648, %v1094_v40 }
  0xd5   :  { %v451_v32 = vadd.f32 %v692_v56, %v450_v52  ;;  %vm452_vm2 = vweird.f32 %v1160_v24  ;;  %v253_v37 = vsel %vm252_vm8, %v1094_v40, %v251_v3  ;;  %v235_v2 = vmul.f32 %v1184_v10, %v234_v41 }
  0xd6   :  { %630 = vst [vmem:[#allocation5 + $0x18] sm:$0xff] %v606_v31   ;;  %vm454_vm3 = vmor %vm452_vm2, %vm453_vm0  ;;  %vm457_vm4 = vcmp.eq.f32.partialorder %v456_v23, 8.507059e+37  ;;  %v459_v43 = vor.u32 1.1754944e-38, %v458_v11  ;;  %v256_v44 = vsel %vm254_vm1, %v255_v14, %v253_v37  ;;  %695 = vrsqrt.f32 %v1222_v30 }
  0xd7   :  { %v694_v1 = vpop.eup %693  ;;  %v476_v40 = vmul.f32 %v475_v36, %v814_v18  ;;  %v455_v9 = vsel %vm454_vm3, %v692_v56, %v451_v32  ;;  %v265_v33 = vsel %vm264_vm12, %v1089_v8, %v263_v27  ;;  %v1246_v47 = vmax.f32 %v256_v44, 1e-12 }
  0xd8   :  { %v425_v48 = vsel %vm1238_vm5, %v1080_v29, %v1166_v0  ;;  %v460_v63 = vsel %vm457_vm4, %v459_v43, %v455_v9  ;;  %v433_v50 = vmul.f32 %v694_v1, %v1205_v53  ;;  %v236_v28 = vmul.f32 0.5, %v235_v2 }
  0xd9   :  { %v429_v55 = vor.u32 1.1754944e-38, %v428_v59  ;;  %v461_v18 = vmul.f32 %v460_v63, %v816_v19  ;;  %vm266_vm6 = vcmp.eq.f32.partialorder %v1089_v8, 0.0  ;;  %vm427_vm7 = vcmp.eq.f32.partialorder %v426_v7, 8.507059e+37 }
  0xda   :  { %v434_v13 = vsub.f32 1.0, %v433_v50  ;;  %v268_v51 = vsel %vm266_vm6, %v267_v45, %v265_v33  ;;  %697 = vrcp.f32 %v1246_v47  ;;  %v443_v42 = vand.u32 2147483648, %v1205_v53 }
  0xdb   :  { %v430_v29 = vsel %vm427_vm7, %v429_v55, %v425_v48  ;;  %v616_v0 = vpack.c.bf16 %v476_v40, %v461_v18  ;;  %vm438_vm8 = vweird.f32 %v694_v1  ;;  %v441_v19 = vand.u32 2147483647, %v1205_v53 }
  0xdc   :  { %v696_v49 = vpop.eup %695  ;;  %v435_v6 = vmul.f32 %v694_v1, %v434_v13  ;;  %v237_v59 = vsub.f32 1.5, %v236_v28  ;;  %v1264_v35 = vmax.f32 %v268_v51, 1e-12  ;;  %vm437_vm9 = vweird.f32 %v1205_v53 }
  0xdd   :  { %632 = vst [vmem:[#allocation5 + $0x28] sm:$0xff] %v616_v0   ;;  %v270_v60 = vmul.f32 %v696_v49, %v1222_v30  ;;  %v431_v45 = vmul.f32 %v430_v29, %v802_v12  ;;  %vm439_vm10 = vmor %vm437_vm9, %vm438_vm8  ;;  %v444_v56 = vor.u32 1.1754944e-38, %v443_v42  ;;  %vm442_vm11 = vcmp.eq.f32.partialorder %v441_v19, 8.507059e+37 }
  0xde   :  { %v436_v7 = vadd.f32 %v694_v1, %v435_v6  ;;  %v238_v8 = vmul.f32 %v1184_v10, %v237_v59  ;;  %vm240_vm12 = vcmp.eq.f32.partialorder %v1152_v46, inf  ;;  %699 = vrcp.f32 %v1264_v35 }
  0xdf   :  { %v271_v58 = vmul.f32 %v696_v49, %v270_v60  ;;  %v243_v53 = vand.u32 2147483648, %v1152_v46  ;;  %vm242_vm13 = vcmp.eq.f32.partialorder %v1152_v46, 0.0  ;;  %vm276_vm14 = vcmp.eq.f32.partialorder %v1222_v30, inf }
  0xe0   :  { %v698_v61 = vpop.eup %697  ;;  %v440_v5 = vsel %vm439_vm10, %v694_v1, %v436_v7  ;;  %v239_v54 = vmul.f32 %v238_v8, %v1152_v46  ;;  %vm278_vm0 = vcmp.eq.f32.partialorder %v1222_v30, 0.0  ;;  %v503_v27 = vand.u32 2147483648, %v1246_v47  ;;  %v705_v8 = vld [vmem:[#allocation2 + $0x70] sm:$0xff] }
  0xe1   :  { %v445_v21 = vsel %vm442_vm11, %v444_v56, %v440_v5  ;;  %v493_v62 = vmul.f32 %v698_v61, %v1246_v47  ;;  %v272_v15 = vmul.f32 0.5, %v271_v58  ;;  %vm498_vm15 = vweird.f32 %v698_v61  ;;  %v706_v56 = vld [vmem:[#allocation2 + $0x78] sm:$0xff] }
  0xe2   :  { %v446_v10 = vmul.f32 %v445_v21, %v818_v20  ;;  %v241_v12 = vsel %vm240_vm12, %v1152_v46, %v239_v54  ;;  %v279_v20 = vand.u32 2147483648, %v1222_v30  ;;  %vm497_vm1 = vweird.f32 %v1246_v47 }
  0xe3   :  { %v494_v16 = vsub.f32 1.0, %v493_v62  ;;  %v244_v22 = vsel %vm242_vm13, %v243_v53, %v241_v12  ;;  %v273_v17 = vsub.f32 1.5, %v272_v15  ;;  %v501_v31 = vand.u32 2147483647, %v1246_v47  ;;  %vm499_vm2 = vmor %vm497_vm1, %vm498_vm15 }
  0xe4   :  { %v611_v38 = vpack.c.bf16 %v446_v10, %v431_v45  ;;  %v293_v39 = vmax.f32 %v244_v22, 1e-12  ;;  %v700_v57 = vpop.eup %699  ;;  %v504_v43 = vor.u32 1.1754944e-38, %v503_v27  ;;  %v518_v18 = vand.u32 2147483648, %v1264_v35 }
  0xe5   :  { %v495_v41 = vmul.f32 %v698_v61, %v494_v16  ;;  %v274_v4 = vmul.f32 %v696_v49, %v273_v17  ;;  %v508_v23 = vmul.f32 %v700_v57, %v1264_v35  ;;  %vm502_vm3 = vcmp.eq.f32.partialorder %v501_v31, 8.507059e+37 }
  0xe6   :  { %631 = vst [vmem:[#allocation5 + $0x20] sm:$0xff] %v611_v38   ;;  %701 = vrcp.f32 %v293_v39  ;;  %v488_v44 = vand.u32 2147483648, %v293_v39  ;;  %vm482_vm5 = vweird.f32 %v293_v39  ;;  %vm513_vm8 = vweird.f32 %v700_v57 }
  0xe7   :  { %v275_v34 = vmul.f32 %v274_v4, %v1222_v30  ;;  %v496_v46 = vadd.f32 %v698_v61, %v495_v41  ;;  %v509_v32 = vsub.f32 1.0, %v508_v23  ;;  %vm512_vm9 = vweird.f32 %v1264_v35 }
  0xe8   :  { %v489_v33 = vor.u32 1.1754944e-38, %v488_v44  ;;  %v516_v51 = vand.u32 2147483647, %v1264_v35  ;;  %vm514_vm10 = vmor %vm512_vm9, %vm513_vm8  ;;  %v519_v19 = vor.u32 1.1754944e-38, %v518_v18 }
  0xe9   :  { %v277_v11 = vsel %vm276_vm14, %v1222_v30, %v275_v34  ;;  %v500_v37 = vsel %vm499_vm2, %v698_v61, %v496_v46  ;;  %v486_v30 = vand.u32 2147483647, %v293_v39  ;;  %v510_v24 = vmul.f32 %v700_v57, %v509_v32 }
  0xea   :  { %v280_v3 = vsel %vm278_vm0, %v279_v20, %v277_v11  ;;  %v505_v40 = vsel %vm502_vm3, %v504_v43, %v500_v37  ;;  %vm517_vm12 = vcmp.eq.f32.partialorder %v516_v51, 8.507059e+37 }
  0xeb   :  { %v296_v14 = vmax.f32 %v280_v3, 1e-12  ;;  %v506_v48 = vmul.f32 %v505_v40, %v826_v25  ;;  %vm487_vm7 = vcmp.eq.f32.partialorder %v486_v30, 8.507059e+37  ;;  %v511_v50 = vadd.f32 %v700_v57, %v510_v24 }
  0xec   :  { %v702_v52 = vpop.eup %701 }
  0xed   :  { %v478_v36 = vmul.f32 %v702_v52, %v293_v39  ;;  %703 = vrcp.f32 %v296_v14  ;;  %vm483_vm4 = vweird.f32 %v702_v52  ;;  %v533_v42 = vand.u32 2147483648, %v296_v14 }
  0xee   :  { %vm484_vm6 = vmor %vm482_vm5, %vm483_vm4  ;;  %v515_v49 = vsel %vm514_vm10, %v700_v57, %v511_v50  ;;  %v531_v6 = vand.u32 2147483647, %v296_v14  ;;  %vm527_vm13 = vweird.f32 %v296_v14 }
  0xef   :  { %v479_v2 = vsub.f32 1.0, %v478_v36  ;;  %v520_v60 = vsel %vm517_vm12, %v519_v19, %v515_v49 }
  0xf0   :  { %vm532_vm15 = vcmp.eq.f32.partialorder %v531_v6, 8.507059e+37  ;;  %v521_v45 = vmul.f32 %v705_v8, %v520_v60 }
  0xf1   :  { %v480_v1 = vmul.f32 %v702_v52, %v479_v2 }
  0xf3   :  { %v481_v9 = vadd.f32 %v702_v52, %v480_v1  ;;  %v704_v47 = vpop.eup %703 }
  0xf4   :  { %v523_v55 = vmul.f32 %v704_v47, %v296_v14  ;;  %vm528_vm11 = vweird.f32 %v704_v47 }
  0xf5   :  { %v485_v63 = vsel %vm484_vm6, %v702_v52, %v481_v9  ;;  %vm529_vm14 = vmor %vm527_vm13, %vm528_vm11 }
  0xf6   :  { %v490_v28 = vsel %vm487_vm7, %v489_v33, %v485_v63  ;;  %v524_v29 = vsub.f32 1.0, %v523_v55 }
  0xf7   :  { %v491_v13 = vmul.f32 %v490_v28, %v828_v26  ;;  %v534_v26 = vor.u32 1.1754944e-38, %v533_v42 }
  0xf8   :  { %v525_v25 = vmul.f32 %v704_v47, %v524_v29 }
  0xf9   :  { %v621_v0 = vpack.c.bf16 %v506_v48, %v491_v13 }
  0xfa   :  { %v526_v59 = vadd.f32 %v704_v47, %v525_v25 }
  0xfb   :  { %633 = vst [vmem:[#allocation5 + $0x30] sm:$0xff] %v621_v0  }
  0xfc   :  { %v530_v7 = vsel %vm529_vm14, %v704_v47, %v526_v59 }
  0xfd   :  { %v535_v35 = vsel %vm532_vm15, %v534_v26, %v530_v7 }
  0xfe   :  { %v536_v58 = vmul.f32 %v706_v56, %v535_v35 }
 0x100   :  { %v626_v61 = vpack.c.bf16 %v536_v58, %v521_v45 }
 0x102   :  { %634 = vst [vmem:[#allocation5 + $0x38] sm:$0xff] %v626_v61  }
 0x103   :  { %581 = dma.vmem_to_hbm [thread:$0]  %s574_s13, 1024, %s576_s16, [#allocation4], %s763_s17, %s763_s17, %s764_s18  }
 0x104   :  { %757 = dma.done.wait [#allocation4], 1024  }
 0x105   :  { %758 = vsyncadd [#allocation4], 4294966272 }
 0x106   :  { %586 = vsyncpa [#allocation3], 1 }
 0x107   :  { %587 = vsyncpa [#allocation4], 1 }

</bundles_post_ra>
